<compile_context>
chip_gen: v7x
topology: tpu7x:2x2x1
jax: 0.10.0
libtpu: 0.0.40
codegen_flags: <defaults>
</compile_context>

<pallas_src>
import math

import jax
import jax.numpy as jnp
from jax.experimental import pallas as pl
from jax.experimental.pallas import tpu as pltpu

NEG_SLOPE = 0.01      # nn.LeakyReLU() default negative_slope
LANE = 128            # lane width: Cout padding target (lane-dense stores)
SUBPACK = 16          # bf16 sublane pack: Cin padding target (review item 3)
TM_MAX = 512          # max rows per M tile for the head path
FUSE_SPATIAL = 8      # conv layers with input spatial <= this are fused


def _round_up(n, m):
    return ((n + m - 1) // m) * m


# ----------------------------------------------------------------------------
# Head kernels: one folded conv tile / EqualLinear tile per grid step.
# ----------------------------------------------------------------------------
def _conv_kernel(p_ref, w_ref, b_ref, o_ref):
    """(tm, 9*Cin) x (9*Cin, Cout) matmul + bias + LeakyReLU."""
    acc = jnp.dot(p_ref[...], w_ref[...], preferred_element_type=jnp.float32)
    acc = acc + b_ref[...]
    o_ref[...] = jnp.maximum(acc, NEG_SLOPE * acc).astype(o_ref.dtype)


def _equal_linear_kernel(x_ref, wt_ref, b_ref, o_ref):
    """EqualLinear (lr_mul=1): y = x @ (scale*W)^T + b, scale pre-folded."""
    y = jnp.dot(x_ref[...], wt_ref[...], preferred_element_type=jnp.float32)
    o_ref[...] = (y + b_ref[...]).astype(o_ref.dtype)


def _pick_tm(m):
    """Row-tile size: cap at TM_MAX and always give >=2 tiles when possible so
    the parallel grid axis can shard across both v7x TensorCores."""
    if m > TM_MAX:
        return TM_MAX
    if m >= 16:
        return _round_up((m + 1) // 2, 8)
    return m


def _row_tiled_call(kernel, x, *full_args, out_cols, out_dtype):
    m, k = x.shape
    tm = _pick_tm(m)
    grid = (pl.cdiv(m, tm),)

    in_specs = [pl.BlockSpec((tm, k), lambda i: (i, 0))]
    for a in full_args:
        in_specs.append(pl.BlockSpec(a.shape, lambda i, n=a.ndim: (0,) * n))
    out_specs = pl.BlockSpec((tm, out_cols), lambda i: (i, 0))

    out_bytes = jnp.dtype(out_dtype).itemsize
    need = (2 * tm * k * x.dtype.itemsize
            + 2 * sum(int(a.size) * a.dtype.itemsize for a in full_args)
            + 2 * tm * out_cols * out_bytes)
    vmem_limit = max(32 << 20, min(64 << 20, need + (8 << 20)))

    return pl.pallas_call(
        kernel,
        out_shape=jax.ShapeDtypeStruct((m, out_cols), out_dtype),
        grid=grid,
        in_specs=in_specs,
        out_specs=out_specs,
        compiler_params=pltpu.CompilerParams(
            dimension_semantics=("parallel",),
            vmem_limit_bytes=vmem_limit,
        ),
    )(x, *full_args)


# ----------------------------------------------------------------------------
# XLA-side im2col for the head conv layers (Conv2d k=3, s=2, p=1, NHWC).
# Taps ordered (kh, kw, c) to match the folded weight layout.
# ----------------------------------------------------------------------------
def _extract_patches(x):
    n, h, w, c = x.shape
    ho = (h - 1) // 2 + 1
    wo = (w - 1) // 2 + 1
    xp = jnp.pad(x, ((0, 0), (1, 1), (1, 1), (0, 0)))
    taps = []
    for kh in range(3):
        for kw in range(3):
            taps.append(xp[:, kh::2, kw::2, :][:, :ho, :wo, :])
    patches = jnp.concatenate(taps, axis=-1)          # (n, ho, wo, 9*c)
    return patches.reshape(n * ho * wo, 9 * c), (n, ho, wo)


# ----------------------------------------------------------------------------
# Fused tail kernel: remaining conv layers + EqualLinear in one pallas_call.
# Activations live in VMEM; folded conv weights are streamed from HBM with a
# double-buffered async copy.  im2col is a static per-output-position gather
# (zero taps for out-of-range positions replicate padding=1).
# ----------------------------------------------------------------------------
def _make_tail_kernel(n, spatials, cp, n_convs):
    def kernel(x_ref, b_all_ref, wlin_ref, blin_ref, w_hbm, o_ref,
               wbuf, sem, pscr, *abufs):
        def wcopy(l):
            return pltpu.make_async_copy(w_hbm.at[l], wbuf.at[l % 2],
                                         sem.at[l % 2])

        wcopy(0).start()                              # prefetch layer-0 weight
        zero_tap = jnp.zeros((1, cp), jnp.float32)
        srcs = (x_ref,) + abufs                       # srcs[l] = layer-l input

        feats = None
        for l in range(n_convs):
            h = spatials[l]
            ho_n = h // 2                             # output spatial
            src = srcs[l]

            # In-kernel im2col: build one (1, 9*C) patch row per output
            # position (all indices are trace-time constants).
            row = 0
            for ni in range(n):
                for ho in range(ho_n):
                    for wo in range(ho_n):
                        taps = []
                        for kh in range(3):
                            r = 2 * ho + kh - 1
                            for kw in range(3):
                                c = 2 * wo + kw - 1
                                if 0 <= r < h and 0 <= c < h:
                                    taps.append(src[ni, r, pl.ds(c, 1), :])
                                else:
                                    taps.append(zero_tap)
                        pscr[pl.ds(row, 1), :] = jnp.concatenate(taps, axis=-1)
                        row += 1
            m = row

            wcopy(l).wait()                           # layer-l weight ready
            if l + 1 < n_convs:
                wcopy(l + 1).start()                  # prefetch next weight

            p = pscr[pl.ds(0, m), :].astype(jnp.bfloat16)
            acc = jnp.dot(p, wbuf[l % 2], preferred_element_type=jnp.float32)
            acc = acc + b_all_ref[l]
            act = jnp.maximum(acc, NEG_SLOPE * acc)   # f32 (m, C)

            if l + 1 < n_convs:
                dst = srcs[l + 1]                     # (n, ho_n, ho_n, C)
                row = 0
                for ni in range(n):
                    for ho in range(ho_n):
                        dst[ni, ho, :, :] = act[row:row + ho_n, :]
                        row += ho_n
            else:
                feats = act                           # spatial is 1x1 -> (n, C)

        # EqualLinear: y = feats @ (scale*W)^T + b (scale pre-folded).
        y = jnp.dot(feats.astype(jnp.bfloat16), wlin_ref[...],
                    preferred_element_type=jnp.float32)
        o_ref[...] = (y + blin_ref[...]).astype(o_ref.dtype)

    return kernel


def _fused_tail_call(x, tail_ws, tail_bs, wlin, blin, cp_out):
    n, s, _, c = x.shape
    lt = len(tail_ws)
    spatials = [s // (2 ** i) for i in range(lt)]
    w_all = jnp.stack(tail_ws)                        # (lt, 9*C, C) bf16, HBM
    b_all = jnp.stack(tail_bs)                        # (lt, 1, C)  f32
    m_max = n * (spatials[0] // 2) ** 2

    kernel = _make_tail_kernel(n, spatials, c, lt)

    scratch = [
        pltpu.VMEM((2, 9 * c, c), jnp.bfloat16),      # streamed-weight buffers
        pltpu.SemaphoreType.DMA((2,)),
        pltpu.VMEM((m_max, 9 * c), jnp.float32),      # im2col patch rows
    ]
    scratch += [pltpu.VMEM((n, sp, sp, c), jnp.float32) for sp in spatials[1:]]

    xf = x.astype(jnp.float32)
    need = (2 * int(xf.size) * 4 + 2 * int(b_all.size) * 4
            + 2 * int(wlin.size) * 2 + 2 * int(blin.size) * 4
            + 2 * n * cp_out * 4
            + 2 * 9 * c * c * 2 + m_max * 9 * c * 4
            + sum(n * sp * sp * c * 4 for sp in spatials[1:]))
    vmem_limit = max(32 << 20, min(64 << 20, need + (8 << 20)))

    return pl.pallas_call(
        kernel,
        out_shape=jax.ShapeDtypeStruct((n, cp_out), jnp.float32),
        in_specs=[
            pl.BlockSpec(memory_space=pltpu.MemorySpace.VMEM),   # x (tail input)
            pl.BlockSpec(memory_space=pltpu.MemorySpace.VMEM),   # conv biases
            pl.BlockSpec(memory_space=pltpu.MemorySpace.VMEM),   # linear weight
            pl.BlockSpec(memory_space=pltpu.MemorySpace.VMEM),   # linear bias
            pl.BlockSpec(memory_space=pl.ANY),                   # conv weights stay in HBM
        ],
        out_specs=pl.BlockSpec(memory_space=pltpu.MemorySpace.VMEM),
        scratch_shapes=scratch,
        compiler_params=pltpu.CompilerParams(vmem_limit_bytes=vmem_limit),
    )(xf, b_all, wlin, blin, w_all)


# ----------------------------------------------------------------------------
# Parameters (deterministic, synthetic) in folded / padded matmul layouts.
# ----------------------------------------------------------------------------
def init_params(key, in_c, out_c, spatial):
    num_pools = int(math.log2(spatial))
    cp_out = _round_up(out_c, LANE)          # lane-dense outputs
    cp_in0 = _round_up(in_c, SUBPACK)        # first-layer Cin: sublane pack only

    convs = []
    cin, cp_in = in_c, cp_in0
    for _ in range(num_pools):
        key, k1, k2 = jax.random.split(key, 3)
        w = jax.random.normal(k1, (out_c, cin, 3, 3), jnp.float32) * 0.05  # OIHW
        b = jax.random.normal(k2, (out_c,), jnp.float32) * 0.01
        wp = jnp.zeros((cp_out, cp_in, 3, 3), jnp.float32).at[:out_c, :cin].set(w)
        # OIHW -> (kh, kw, Cin, Cout) -> folded (9*Cin, Cout)
        w_fold = jnp.transpose(wp, (2, 3, 1, 0)).reshape(9 * cp_in, cp_out)
        bp = jnp.zeros((1, cp_out), jnp.float32).at[0, :out_c].set(b)
        convs.append((w_fold.astype(jnp.bfloat16), bp))
        cin, cp_in = out_c, cp_out

    # EqualLinear(out_c, out_c, lr_mul=1): scale = 1/sqrt(in_dim), b = 0.
    key, k3 = jax.random.split(key)
    lr_mul = 1.0
    w_lin = jax.random.normal(k3, (out_c, out_c), jnp.float32) / lr_mul
    b_lin = jnp.zeros((out_c,), jnp.float32) * lr_mul
    scale = (1.0 / math.sqrt(out_c)) * lr_mul
    wt = jnp.transpose(w_lin) * scale
    wt_p = jnp.zeros((cp_out, cp_out), jnp.float32).at[:out_c, :out_c].set(wt)
    b_p = jnp.zeros((1, cp_out), jnp.float32).at[0, :out_c].set(b_lin)
    return {"convs": convs, "linear": (wt_p.astype(jnp.bfloat16), b_p),
            "cp_in0": cp_in0, "cp_out": cp_out}


# ----------------------------------------------------------------------------
# Forward pass (matches GradualStyleBlock.forward).
# ----------------------------------------------------------------------------
def gradual_style_block_forward(x_nchw, params, out_c):
    convs = params["convs"]
    cp_in0 = params["cp_in0"]
    cp_out = params["cp_out"]
    num_pools = len(convs)

    # NCHW -> NHWC, zero-pad channels, bf16.
    x = jnp.transpose(x_nchw, (0, 2, 3, 1))
    x = jnp.pad(x, ((0, 0), (0, 0), (0, 0), (0, cp_in0 - x.shape[-1])))
    x = x.astype(jnp.bfloat16)

    spatial = x.shape[1]
    n_head = 0
    for idx in range(num_pools):
        s_in = spatial // (2 ** idx)
        if idx == 0 or s_in > FUSE_SPATIAL:
            n_head += 1
        else:
            break

    # HEAD: row-tiled folded-conv matmuls (pipelined, parallel grid).
    for w_fold, b in convs[:n_head]:
        patches, (n, ho, wo) = _extract_patches(x)
        y = _row_tiled_call(_conv_kernel, patches, w_fold, b,
                            out_cols=cp_out, out_dtype=jnp.bfloat16)
        x = y.reshape(n, ho, wo, cp_out)

    wlin, blin = params["linear"]
    if n_head == num_pools:
        # Degenerate case (spatial <= 2): no tail convs -> standalone linear.
        feats = x.reshape(-1, cp_out)
        y = _row_tiled_call(_equal_linear_kernel, feats, wlin, blin,
                            out_cols=cp_out, out_dtype=jnp.float32)
    else:
        tail = convs[n_head:]
        y = _fused_tail_call(x, [w for w, _ in tail], [b for _, b in tail],
                             wlin, blin, cp_out)
    return y[:, :out_c]


# ----------------------------------------------------------------------------
# Pure-JAX reference (same folded weights, f32 math) for a sanity check.
# ----------------------------------------------------------------------------
def _reference_forward(x_nchw, params, out_c):
    cp_in0 = params["cp_in0"]
    cp_out = params["cp_out"]
    x = jnp.transpose(x_nchw, (0, 2, 3, 1))
    x = jnp.pad(x, ((0, 0), (0, 0), (0, 0), (0, cp_in0 - x.shape[-1])))
    x = x.astype(jnp.float32)
    for w_fold, b in params["convs"]:
        patches, (n, ho, wo) = _extract_patches(x)
        y = patches @ w_fold.astype(jnp.float32) + b
        y = jnp.maximum(y, NEG_SLOPE * y)
        x = y.reshape(n, ho, wo, cp_out)
    feats = x.reshape(-1, cp_out)
    wt, bl = params["linear"]
    y = feats @ wt.astype(jnp.float32) + bl
    return y[:, :out_c]


if __name__ == "__main__":
    key = jax.random.PRNGKey(0)
    N, in_c, out_c, spatial = 2, 4, 32, 16   # small but consistent with module
    kx, kp = jax.random.split(key)

    # Input in the PyTorch NCHW convention, as the module would receive it.
    x = jax.random.normal(kx, (N, in_c, spatial, spatial), jnp.float32)
    params = init_params(kp, in_c, out_c, spatial)

    y = gradual_style_block_forward(x, params, out_c)
    jax.block_until_ready(y)
    assert y.shape == (N, out_c) and y.dtype == jnp.float32

    # Loose tolerance: the kernel path uses bf16 operands (f32 accumulation).
    y_ref = _reference_forward(x, params, out_c)
    err = float(jnp.max(jnp.abs(y - y_ref)))
    scale = float(jnp.max(jnp.abs(y_ref))) + 1e-3
    assert err < 5e-2 * scale, f"mismatch: max abs err {err} (scale {scale})"

    print("KERNEL_OK")
</pallas_src>

<mosaic_0001>
module attributes {stable_mosaic.version = 11 : i64} {
  func.func @_conv_kernel(%arg0: i32, %arg1: memref<64x144xbf16, #tpu.memory_space<vmem>>, %arg2: memref<144x128xbf16, #tpu.memory_space<vmem>>, %arg3: memref<1x128xf32, #tpu.memory_space<vmem>>, %arg4: memref<64x128xbf16, #tpu.memory_space<vmem>>) attributes {dimension_semantics = [#tpu.dimension_semantics<parallel>], iteration_bounds = array<i64: 2>, scalar_prefetch = 0 : i64, scratch_operands = 0 : i64, tpu.core_type = #tpu.core_type<tc>, window_params = [{transform_indices = @transform_0, window_bounds = array<i64: 64, 144>}, {pipeline_mode = #tpu.pipeline_mode<synchronous>, transform_indices = @transform_1, window_bounds = array<i64: 144, 128>}, {pipeline_mode = #tpu.pipeline_mode<synchronous>, transform_indices = @transform_2, window_bounds = array<i64: 1, 128>}, {transform_indices = @transform_3, window_bounds = array<i64: 64, 128>}]} {
    %c0 = arith.constant 0 : index
    %c0_0 = arith.constant 0 : index
    %0 = vector.load %arg1[%c0, %c0_0] : memref<64x144xbf16, #tpu.memory_space<vmem>>, vector<64x144xbf16>
    %c0_1 = arith.constant 0 : index
    %c0_2 = arith.constant 0 : index
    %1 = vector.load %arg2[%c0_1, %c0_2] : memref<144x128xbf16, #tpu.memory_space<vmem>>, vector<144x128xbf16>
    %cst = arith.constant dense<0.000000e+00> : vector<64x128xf32>
    %2 = tpu.matmul %0, %1, %cst {dimension_numbers = #tpu.dot_dimension_numbers<[1], [0], [0], [1], [0, 0, 1, 1], [], []>} : vector<64x144xbf16>, vector<144x128xbf16>, vector<64x128xf32> -> vector<64x128xf32>
    %c0_3 = arith.constant 0 : index
    %c0_4 = arith.constant 0 : index
    %3 = vector.load %arg3[%c0_3, %c0_4] : memref<1x128xf32, #tpu.memory_space<vmem>>, vector<1x128xf32>
    %4 = vector.broadcast %3 : vector<1x128xf32> to vector<64x128xf32>
    %5 = arith.addf %2, %4 : vector<64x128xf32>
    %cst_5 = arith.constant 0.00999999977 : f32
    %6 = vector.broadcast %cst_5 : f32 to vector<64x128xf32>
    %7 = arith.mulf %6, %5 : vector<64x128xf32>
    %8 = arith.maximumf %5, %7 : vector<64x128xf32>
    %9 = arith.truncf %8 : vector<64x128xf32> to vector<64x128xbf16>
    %c0_6 = arith.constant 0 : index
    %c0_7 = arith.constant 0 : index
    %10 = vector.load %arg4[%c0_6, %c0_7] : memref<64x128xbf16, #tpu.memory_space<vmem>>, vector<64x128xbf16>
    tpu.vector_store %arg4[%c0_6, %c0_7], %9 {strides = array<i32>} : memref<64x128xbf16, #tpu.memory_space<vmem>>, vector<64x128xbf16>,
    return
  }
  func.func @transform_0(%arg0: i32) -> (i32, i32) {
    %c0_i32 = arith.constant 0 : i32
    %c0_i32_0 = arith.constant 0 : i32
    return %arg0, %c0_i32 : i32, i32
  }
  func.func @transform_1(%arg0: i32) -> (i32, i32) {
    %c0_i32 = arith.constant 0 : i32
    %c0_i32_0 = arith.constant 0 : i32
    %c0_i32_1 = arith.constant 0 : i32
    return %c0_i32, %c0_i32_0 : i32, i32
  }
  func.func @transform_2(%arg0: i32) -> (i32, i32) {
    %c0_i32 = arith.constant 0 : i32
    %c0_i32_0 = arith.constant 0 : i32
    %c0_i32_1 = arith.constant 0 : i32
    return %c0_i32, %c0_i32_0 : i32, i32
  }
  func.func @transform_3(%arg0: i32) -> (i32, i32) {
    %c0_i32 = arith.constant 0 : i32
    %c0_i32_0 = arith.constant 0 : i32
    return %arg0, %c0_i32 : i32, i32
  }
}

</mosaic_0001>

<bundles_post_ra>
// kernel: tpu_custom_call.1
= control target key start
LH: loop header
LB: loop body
LE: loop exit
PB: predicated region body
PF: predicated region fallthrough
CT: control target
= control target key end

     0   :  { %8 = vsyncpa [#allocation3], 0  ;;  %s904_s0 = inlined_call_operand.vmem [shape: bf16[128,144], index: 0, kind: input, shape index: {}]   ;;  %s905_s1 = inlined_call_operand.vmem [shape: bf16[144,128], index: 1, kind: input, shape index: {}]   ;;  %s906_s2 = inlined_call_operand.vmem [shape: f32[1,128], index: 2, kind: input, shape index: {}]   ;;  %s907_s3 = inlined_call_operand.hbm [shape: bf16[128,128], index: 3, kind: output, shape index: {}]  }
   0x1   :  { %10 = vsyncpa [#allocation3 + $0x1], 0  ;;  %s754_s12 = smov 0   ;;  %s756_s13 = smov 0  }
   0x2   :  { %s758_s14 = smov 0   ;;  %s760_s15 = smov 0  }
   0x3 LB: > { %s775_s16 = sadd.s32 4294967295, %s728_s15   ;;  %s509_s17 = sadd.s32 4294967294, %s728_s15   ;;  %s728_s15 = sphi %s760_s15, %s913_s15   ;;  %s724_s14 = sphi %s758_s14, %s912_s14   ;;  %s720_s13 = sphi %s756_s13, %s911_s13   ;;  %s716_s12 = sphi %s754_s12, %s910_s12  }
   0x4   : > { %s779_s18 = sadd.s32 1, %s728_s15   ;;  %s91_s19 = sadd.s32 1, %s724_s14 }
   0x5   : > { %s88_s20 = ssub.s32 %s728_s15, %s779_s18  ;;  %p101_p0 = scmp.ne.s32.totalorder %s724_s14, %s720_s13 }
   0x6   : > { %p89_p1 = scmp.eq.s32.totalorder %s88_s20, 0  ;;  %p102_p2 = scmp.eq.s32.totalorder %s775_s16, 1 }
   0x7   : > { %p107_p3 = scmp.ne.s32.totalorder %s720_s13, %s716_s12  ;;  %p108_p4 = scmp.eq.s32.totalorder %s509_s17, 1 }
   0x8   : > { %s790_s21 = scalar_select %p89_p1, %s724_s14, %s91_s19  }
   0x9   : > { %p792_p5 = por %p102_p2, %p101_p0  ;;  %p796_p6 = por %p108_p4, %p107_p3 }
   0xa   : > { %p512_p7 = scmp.ge.s32.totalorder %s728_s15, 1  ;;  %p142_p8 = scmp.lt.s32.totalorder %s728_s15, 3 }
   0xc   : > { %p143_p9 = pnand %p512_p7, %p142_p8 }
   0xd   : > { %v645_v0 = vld [vmem:[%s905_s1] sm:$0xff] (!%p143_p9)   ;;  %v730_v1 = vmov (!%p143_p9), 0   ;;  %s514_s26 = sshll.u32 (!%p143_p9), %s775_s16, 3  ;;  %v646_v2 = vld [vmem:[%s905_s1 + $0x8] sm:$0xff] (!%p143_p9)   ;;  %v647_v3 = vld [vmem:[%s905_s1 + $0x10] sm:$0xff] (!%p143_p9)   ;;  %vm299_vm0 = vcmask (!%p143_p9), 130048  }
   0xe   : > { %146 = sbr.rel (%p143_p9) target bundleno = 295 (0x127), region = 32  ;;  %312 = vmatprep.subr.bf16.mxu0 (!%p143_p9), %v730_v1  ;;  %585 = vmatprep.subr.bf16.mxu1 (!%p143_p9), %v730_v1  ;;  %p168_p10 = scmp.lt.s32.totalorder (!%p143_p9), %s514_s26, 15  ;;  %v648_v4 = vld [vmem:[%s905_s1 + $0x18] sm:$0xff] (!%p143_p9)   ;;  %v649_v7 = vld [vmem:[%s905_s1 + $0x20] sm:$0xff] (!%p143_p9)   ;;  %v650_v8 = vld [vmem:[%s905_s1 + $0x28] sm:$0xff] (!%p143_p9)  }
   0xf   : > { %313 = vmatpush1.bf16.msra.mxu0 (!%p143_p9), %v645_v0  ;;  %594 = vmatpush1.bf16.msra.mxu1 (!%p143_p9), %v645_v0  ;;  %v651_v9 = vld [vmem:[%s905_s1 + $0x30] sm:$0xff] (!%p143_p9)   ;;  %v652_v10 = vld [vmem:[%s905_s1 + $0x38] sm:$0xff] (!%p143_p9)   ;;  %v653_v11 = vld [vmem:[%s905_s1 + $0x40] sm:$0xff] (!%p143_p9)   ;;  %s561_s8 = sshll.u32 (!%p143_p9), %s775_s16, 9  ;;  %s731_s19 = smov (!%p143_p9), [#allocation2]  }
  0x10   : > { %314 = vmatprep.subr.bf16.mxu0 (!%p143_p9), %v730_v1  ;;  %586 = vmatprep.subr.bf16.mxu1 (!%p143_p9), %v730_v1  ;;  %v517_v18 = vld [vmem:[%s906_s2] ss:$0 sm:$0xff] (!%p143_p9)  ;;  %s859_s11 = scalar_lea.hbm (!%p143_p9), %s907_s3, %s561_s8  ;;  %s670_s20 = sshll.u32 (!%p143_p9), %s731_s19, 4  ;;  %s671_s20 = int_to_ptr.vmem [resolvable:$false] %s670_s20 }
  0x11   : > { %s672_s24 = scalar_lea.vmem (!%p143_p9), %s671_s20, 1024 }
  0x13   : > { %315 = vmatpush1.bf16.msra.mxu0 (!%p143_p9), %v646_v2  ;;  %595 = vmatpush1.bf16.msra.mxu1 (!%p143_p9), %v646_v2 }
  0x14   : > { %316 = vmatprep.subr.bf16.mxu0 (!%p143_p9), %v730_v1  ;;  %587 = vmatprep.subr.bf16.mxu1 (!%p143_p9), %v730_v1 }
  0x15   : > { %s915_s26 = smov (!%p168_p10, %s514_s26), 15 }
  0x16   : > { %s552_s4 = sshll.u32 %s915_s26, 3 }
  0x17   : > { %s815_s7 = scalar_lea.vmem %s904_s0, %s552_s4  ;;  %317 = vmatpush1.bf16.msra.mxu0 %v647_v3  ;;  %596 = vmatpush1.bf16.msra.mxu1 %v647_v3  ;;  %s164_s4 = sand.u32 1, %s720_s13  }
  0x18   : > { %v656_v5 = vld [vmem:[%s815_s7 + $0x4] ss:$8 sps:$4 sm:$0xff]   ;;  %318 = vmatprep.subr.bf16.mxu0 %v730_v1  ;;  %588 = vmatprep.subr.bf16.mxu1 %v730_v1  ;;  %v654_v12 = vld [vmem:[%s815_s7] ss:$8 sps:$4 sm:$0xff]   ;;  %v660_v14 = vld [vmem:[%s815_s7 + $0x14] ss:$8 sps:$4 sm:$0xff]  }
  0x19   : > { %v659_v6 = vld [vmem:[%s815_s7 + $0x24] ss:$8 sps:$4 sm:$0xff]   ;;  %535 = vmatprep.mubr.msk.bf16.mxu0 %vm299_vm0, %v656_v5  ;;  %v657_v13 = vld [vmem:[%s815_s7 + $0x20] ss:$8 sps:$4 sm:$0xff]   ;;  %v662_v15 = vld [vmem:[%s815_s7 + $0x34] ss:$8 sps:$4 sm:$0xff]  }
  0x1a   : > { %537 = vmatprep.mubr.msk.bf16.mxu1 %vm299_vm0, %v659_v6  ;;  %v664_v16 = vld [vmem:[%s815_s7 + $0x10] ss:$8 sps:$4 sm:$0xff]   ;;  %s513_s5 = sshll.u32 %s164_s4, 5  ;;  %s863_s16 = scalar_lea.sflag [#allocation3], %s164_s4 }
  0x1b   : > { %319 = vmatpush1.bf16.msra.mxu0 %v648_v4  ;;  %597 = vmatpush1.bf16.msra.mxu1 %v648_v4  ;;  %v665_v17 = vld [vmem:[%s815_s7 + $0x30] ss:$8 sps:$4 sm:$0xff]   ;;  %s166_s6 = scalar_lea.vmem [#allocation2], %s513_s5 }
  0x1c   : > { %320 = vmatprep.subr.bf16.mxu0 %v730_v1  ;;  %589 = vmatprep.subr.bf16.mxu1 %v730_v1  ;;  %s447_s7 = sshll.u32 %s166_s6, 4  ;;  %s854_s7 = int_to_ptr.vmem [resolvable:$true] %s447_s7 }
  0x1d   : > { %s666_s17 = scalar_lea.vmem %s854_s7, 512  ;;  %p673_p0 = scmp.lt.s32.totalorder %s854_s7, %s671_s20 }
  0x1e   : > { %p667_p11 = scmp.ne.s32.totalorder %s854_s7, %s666_s17  ;;  %p674_p1 = scmp.lt.s32.totalorder %s672_s24, %s666_s17 }
  0x1f   : > { %321 = vmatpush1.bf16.msra.mxu0 %v649_v7  ;;  %598 = vmatpush1.bf16.msra.mxu1 %v649_v7 }
  0x20   : > { %322 = vmatprep.subr.bf16.mxu0 %v730_v1  ;;  %590 = vmatprep.subr.bf16.mxu1 %v730_v1  ;;  %p668_p12 = pnand %p667_p11, %p792_p5  ;;  %p675_p2 = por %p674_p1, %p673_p0 }
  0x22   : > { %p669_p13 = pneg %p668_p12 }
  0x23   : > { %323 = vmatpush1.bf16.msra.mxu0 %v650_v8  ;;  %599 = vmatpush1.bf16.msra.mxu1 %v650_v8 }
  0x24   : > { %324 = vmatprep.subr.bf16.mxu0 %v730_v1  ;;  %591 = vmatprep.subr.bf16.mxu1 %v730_v1  ;;  %p676_p3 = pnand %p675_p2, %p669_p13 }
  0x27   : > { %325 = vmatpush1.bf16.msra.mxu0 %v651_v9  ;;  %600 = vmatpush1.bf16.msra.mxu1 %v651_v9 }
  0x28   : > { %326 = vmatprep.subr.bf16.mxu0 %v730_v1  ;;  %592 = vmatprep.subr.bf16.mxu1 %v730_v1 }
  0x2b   : > { %327 = vmatpush1.bf16.msra.mxu0 %v652_v10  ;;  %601 = vmatpush1.bf16.msra.mxu1 %v652_v10 }
  0x2c   : > { %328 = vmatprep.subr.bf16.mxu0 %v730_v1  ;;  %593 = vmatprep.subr.bf16.mxu1 %v730_v1 }
  0x2f   : > { %329 = vmatpush1.bf16.msra.mxu0 %v653_v11  ;;  %602 = vmatpush1.bf16.msra.mxu1 %v653_v11 }
  0x32   : > { %345 = vmatmul.mubr.bf16.vlgmr.msra.gmra.mrb[0].mxu0 %v654_v12  ;;  %361 = vmatmul.mubr.bf16.vlgmr.msra.gmra.mrb[0].mxu1 %v657_v13 }
  0x33   : > { %536 = vmatprep.mubr.msk.bf16.mxu0 %vm299_vm0, %v660_v14  ;;  %538 = vmatprep.mubr.msk.bf16.mxu1 %vm299_vm0, %v662_v15 }
  0x3a   : > { %353 = vmatmul.mubr.bf16.gmra.mrb[4].mxu0 %v664_v16  ;;  %369 = vmatmul.mubr.bf16.gmra.mrb[4].mxu1 %v665_v17 }
 0x105   : > { %v346_v19 = vpop.f32.mrb[0].mxu0  ;;  %v362_v20 = vpop.f32.mrb[0].mxu1 }
 0x106   : > { %v347_v21 = vadd.f32 %v517_v18, %v346_v19  ;;  %v363_v22 = vadd.f32 %v517_v18, %v362_v20  ;;  %v348_v23 = vpop.f32.mrb[1].mxu0  ;;  %v364_v24 = vpop.f32.mrb[1].mxu1 }
 0x107   : > { %v349_v25 = vpop.f32.mrb[2].mxu0  ;;  %v365_v26 = vpop.f32.mrb[2].mxu1 }
 0x108   : > { %v377_v27 = vmul.f32 0.01, %v347_v21  ;;  %v381_v28 = vmul.f32 0.01, %v363_v22  ;;  %v350_v29 = vadd.f32 %v517_v18, %v349_v25  ;;  %v366_v30 = vadd.f32 %v517_v18, %v365_v26  ;;  %v351_v31 = vpop.f32.mrb[3].mxu0  ;;  %v367_v32 = vpop.f32.mrb[3].mxu1 }
 0x10a   : > { %v378_v33 = vmul.f32 0.01, %v350_v29  ;;  %v382_v34 = vmul.f32 0.01, %v366_v30  ;;  %v385_v35 = vmax.f32 %v347_v21, %v377_v27  ;;  %v389_v36 = vmax.f32 %v363_v22, %v381_v28 }
 0x10c   : > { %v386_v37 = vmax.f32 %v350_v29, %v378_v33  ;;  %v390_v38 = vmax.f32 %v366_v30, %v382_v34 }
 0x10d   : > { %v354_v39 = vpop.f32.mrb[4].mxu0  ;;  %v370_v40 = vpop.f32.mrb[4].mxu1 }
 0x10e   : > { %v565_v41 = vpack.c.bf16 %v386_v37, %v385_v35  ;;  %v575_v42 = vpack.c.bf16 %v390_v38, %v389_v36  ;;  %v355_v43 = vadd.f32 %v517_v18, %v354_v39  ;;  %v371_v44 = vadd.f32 %v517_v18, %v370_v40  ;;  %v356_v45 = vpop.f32.mrb[5].mxu0  ;;  %v372_v46 = vpop.f32.mrb[5].mxu1 }
 0x10f   : > { %v357_v47 = vpop.f32.mrb[6].mxu0  ;;  %v373_v48 = vpop.f32.mrb[6].mxu1 }
 0x110   : > { %566 = vst [vmem:[%s166_s6] sm:$0xff] %v565_v41   ;;  %583 = vst [vmem:[%s166_s6 + $0x10] sm:$0xff] %v575_v42   ;;  %v379_v49 = vmul.f32 0.01, %v355_v43  ;;  %v383_v50 = vmul.f32 0.01, %v371_v44  ;;  %v358_v51 = vadd.f32 %v517_v18, %v357_v47  ;;  %v374_v52 = vadd.f32 %v517_v18, %v373_v48  ;;  %v359_v53 = vpop.f32.mrb[7].mxu0 }
 0x111   : > { %v375_v54 = vpop.f32.mrb[7].mxu1 }
 0x112   : > { %v380_v55 = vmul.f32 0.01, %v358_v51  ;;  %v384_v56 = vmul.f32 0.01, %v374_v52  ;;  %v387_v57 = vmax.f32 %v355_v43, %v379_v49  ;;  %v391_v58 = vmax.f32 %v371_v44, %v383_v50 }
 0x114   : > { %v388_v59 = vmax.f32 %v358_v51, %v380_v55  ;;  %v392_v60 = vmax.f32 %v374_v52, %v384_v56 }
 0x116   : > { %v570_v61 = vpack.c.bf16 %v388_v59, %v387_v57  ;;  %v580_v62 = vpack.c.bf16 %v392_v60, %v391_v58 }
 0x118   : > { %582 = vst [vmem:[%s166_s6 + $0x8] sm:$0xff] %v570_v61   ;;  %584 = vst [vmem:[%s166_s6 + $0x18] sm:$0xff] %v580_v62  }
 0x119   : > { %679 = shalt.err (!%p676_p3)
}
 0x11a   : > { %s680_s25 = scalar_lea.hbm %s859_s11, 512  ;;  %s684_s28 = scalar_lea.hbm %s907_s3, 1024 }
 0x11b   : > { %p681_p4 = scmp.ne.s32.totalorder %s859_s11, %s680_s25  ;;  %p685_p9 = scmp.lt.u32.totalorder %s859_s11, %s907_s3 }
 0x11c   : > { %p686_p10 = scmp.lt.u32.totalorder %s684_s28, %s680_s25  ;;  %p688_p12 = scmp.lt.u32.totalorder %s680_s25, %s859_s11 }
 0x11d   : > { %p682_p7 = pnand %p681_p4, %p792_p5 }
 0x11e   : > { %p687_p11 = por %p686_p10, %p685_p9 }
 0x11f   : > { %p683_p8 = pneg %p682_p7 }
 0x120   : > { %p689_p13 = por %p688_p12, %p687_p11 }
 0x122   : > { %p690_p0 = pnand %p689_p13, %p683_p8 }
 0x124   : > { %693 = shalt.err (!%p690_p0)
}
 0x125   : > { %s732_s4 = smov 64   ;;  %s733_s5 = smov 4  }
 0x126   : > { %603 = dma.vmem_to_hbm [thread:$0]  (%p792_p5), %s854_s7, 512, %s859_s11, %s863_s16, %s732_s4, %s732_s4, %s733_s5  }
 0x127 PF: > { %p609_p1 = scmp.ge.s32.totalorder %s728_s15, 2  ;;  %s462_s6 = sand.u32 1, %s716_s12  }
 0x128   : > { %s463_s8 = scalar_lea.sflag [#allocation3], %s462_s6 }
 0x129   : > { %p606_p2 = pnand %p609_p1, %p796_p6 }
 0x12b   : > { %711 = dma.done.wait (!%p606_p2), %s463_s8, 512  }
 0x12c   : > { %713 = vsyncadd (!%p606_p2), %s463_s8, 4294966784  ;;  %p13_p3 = scmp.ge.s32.totalorder %s779_s18, 4   ;;  %s910_s12 = smov %s720_s13 }
 0x12d   : > { %s911_s13 = smov %s724_s14  ;;  %s912_s14 = smov %s790_s21 }
 0x12e   : > { %s913_s15 = smov %s779_s18  ;;  %15 = sbr.rel (!%p13_p3) target bundleno = 3 (0x3), region = 67 }
 0x135   :  { %468 = vsyncpa [#allocation3], 1 }
 0x136   :  { %470 = vsyncpa [#allocation3 + $0x1], 1 }

</bundles_post_ra>
